<compile_context>
chip_gen: v5e
topology: v5e:2x2
jax: 0.10.0
libtpu: 0.0.40
codegen_flags: <defaults>
</compile_context>

<pallas_src>
import functools
import math

import jax
import jax.numpy as jnp
from jax.experimental import pallas as pl
from jax.experimental.pallas import tpu as pltpu


def _round_up(x, m):
    return ((x + m - 1) // m) * m


def _pick_nb(n, cap):
    """Largest divisor of n that is <= cap (so batch blocks tile n exactly)."""
    cap = max(1, min(int(cap), int(n)))
    for d in range(cap, 0, -1):
        if n % d == 0:
            return d
    return 1


def _fast_recip(x):
    """1/x via EUP approx reciprocal + one Newton step (~1e-7 rel error)."""
    r = pl.reciprocal(x, approx=True)
    return r * (2.0 - x * r)


def _atan_f32(x):
    """float32 arctan: Cephes-style argument reduction + degree-4 polynomial.

    Only ops with guaranteed Pallas/Mosaic TPU lowerings (abs, cmp, where,
    mul, add, maximum, pl.reciprocal).  |error| ~1e-6, far below tolerance.
    """
    pio2 = 1.5707963267948966
    pio4 = 0.7853981633974483
    tan3pio8 = 2.414213562373095
    tanpio8 = 0.4142135623730950

    ax = jnp.abs(x)
    big = ax > tan3pio8
    mid = ax > tanpio8

    # Guarded reciprocals: unselected lanes may hold garbage (boundary tiles)
    # but those lanes are discarded by the masked output store.
    z_big = -_fast_recip(jnp.maximum(ax, 1e-30))
    z_mid = (ax - 1.0) * _fast_recip(ax + 1.0)
    z = jnp.where(big, z_big, jnp.where(mid, z_mid, ax))
    y0 = jnp.where(big, pio2, jnp.where(mid, pio4, 0.0))

    zz = z * z
    p = 8.05374449538e-2
    p = p * zz - 1.38776856032e-1
    p = p * zz + 1.99777106478e-1
    p = p * zz - 3.33329491539e-1
    y = y0 + (p * zz * z + z)
    # TODO(synk): bitwise sign-copy (bitcast + or) would shave ~2 VALU ops.
    return jnp.where(x < 0.0, -y, y)


def _conv1x1_act_kernel(x_ref, w_ref, b_ref, o_ref, *, act_fn, c_out, c_in, nb):
    # x_ref: (nb, C_in, TP)    pixels on lanes, channels on sublanes
    # w_ref: (C_out, C_in), b_ref: (C_out, 1)
    # o_ref: (nb, C_out, TP) or (nb, 2*C_out, TP) for comp/unbias
    w = w_ref[...]
    b = b_ref[...]

    for ib in range(nb):                      # static unroll over images
        x = x_ref[ib]                         # (C_in, TP)

        if c_in <= 16:
            # Tiny-K contraction as an unrolled VPU outer-product sum:
            # (C_out,1) lane-broadcast * (1,TP) sublane-broadcast, accumulated.
            y = w[:, 0:1] * x[0:1, :]
            for ci in range(1, c_in):
                y = y + w[:, ci:ci + 1] * x[ci:ci + 1, :]
        else:
            y = jnp.dot(w, x, preferred_element_type=jnp.float32)
        y = y + b                             # (C_out,1) broadcast over lanes

        if act_fn == "relu":
            # 1/0.58 already folded into W and b by the wrapper.
            o_ref[ib] = (jnp.maximum(y, 0.0) - (0.4 / 0.58)).astype(o_ref.dtype)
        elif act_fn in ("comp", "unbias"):
            a = _atan_f32(y)
            # Two disjoint sublane (channel) ranges -> full-lane-width stores.
            o_ref[ib, 0:c_out, :] = (a * (1.0 / 0.67)).astype(o_ref.dtype)
            if act_fn == "comp":
                o_ref[ib, c_out:2 * c_out, :] = (
                    (a * a) * (1.0 / 0.6)).astype(o_ref.dtype)
            else:
                o_ref[ib, c_out:2 * c_out, :] = (
                    (a * a - 0.45) * (1.0 / 0.396)).astype(o_ref.dtype)
        else:  # sigmoid, via EUP tanh: overflow-free, no divide
            o_ref[ib] = (0.5 * jnp.tanh(0.5 * y) + 0.5).astype(o_ref.dtype)


def conv_layer_forward(x_nchw, weight, bias, act_fn="relu", tile_p=16384,
                       out_dtype=None):
    """x_nchw: (N, C_in, H, W). weight: (C_out, C_in, 1, 1). bias: (C_out,).

    out_dtype: optional output dtype (e.g. jnp.bfloat16 to halve store bytes
    on this write-dominated kernel); defaults to the input dtype.
    """
    n, c_in, h, w = x_nchw.shape
    c_out = weight.shape[0]
    assert weight.shape[1] == c_in
    c_final = 2 * c_out if act_fn in ("comp", "unbias") else c_out
    hw = h * w
    out_dtype = x_nchw.dtype if out_dtype is None else out_dtype

    # Free reshapes only (no transposes): NCHW -> (N, C_in, H*W).
    x_flat = x_nchw.reshape(n, c_in, hw)
    w_mat = weight.reshape(c_out, c_in).astype(jnp.float32)
    b_mat = bias.reshape(c_out, 1).astype(jnp.float32)
    if act_fn == "relu":
        # Fold the 1/0.58 normalization into W and b (relu(z)/s == relu(z/s)
        # for s > 0); this touches only ~40 scalars on the host side.
        w_mat = w_mat * (1.0 / 0.58)
        b_mat = b_mat * (1.0 / 0.58)

    # Lane-dense pixel tile, multiple of 128 (default 16384 pixels per step).
    tile_p = max(128, _round_up(int(tile_p), 128))
    if hw <= tile_p:
        # Small image: take the whole pixel extent and pack several images
        # per grid step, keeping >= 2 batch steps so both TCs get work.
        block_p = hw
        cap = tile_p // max(hw, 1)
        if n > 1:
            cap = min(cap, (n + 1) // 2)
        nb = _pick_nb(n, cap)
    else:
        block_p = tile_p
        nb = 1

    grid = (pl.cdiv(n, nb), pl.cdiv(hw, block_p))

    in_itemsize = jnp.dtype(x_nchw.dtype).itemsize
    out_itemsize = jnp.dtype(out_dtype).itemsize
    trans_per_elem = 3 if act_fn in ("comp", "unbias") else (
        0 if act_fn == "relu" else 1)
    cost = pl.CostEstimate(
        flops=2 * n * hw * c_in * c_out + 4 * n * hw * c_final,
        transcendentals=trans_per_elem * n * hw * c_out,
        bytes_accessed=n * hw * (c_in * in_itemsize + c_final * out_itemsize)
        + (c_out * c_in + c_out) * 4,
    )

    kernel = functools.partial(_conv1x1_act_kernel, act_fn=act_fn,
                               c_out=c_out, c_in=c_in, nb=nb)

    out_flat = pl.pallas_call(
        kernel,
        out_shape=jax.ShapeDtypeStruct((n, c_final, hw), out_dtype),
        grid_spec=pltpu.PrefetchScalarGridSpec(
            num_scalar_prefetch=0,
            grid=grid,
            in_specs=[
                pl.BlockSpec((nb, c_in, block_p), lambda b, p: (b, 0, p)),
                pl.BlockSpec((c_out, c_in), lambda b, p: (0, 0)),
                pl.BlockSpec((c_out, 1), lambda b, p: (0, 0)),
            ],
            out_specs=pl.BlockSpec((nb, c_final, block_p),
                                   lambda b, p: (b, 0, p)),
        ),
        compiler_params=pltpu.CompilerParams(
            dimension_semantics=("parallel", "parallel")),
        cost_estimate=cost,
    )(x_flat, w_mat, b_mat)

    # Free reshape back to NCHW.
    return out_flat.reshape(n, c_final, h, w)


def init_conv_layer_params(key, nf_in, nf_out):
    """Matches ConvLayer.__init__: weight ~ N(0, sqrt(1/nf_in)), bias ~ U(-0.5, 0.5)."""
    k_w, k_b = jax.random.split(key)
    weight = jax.random.normal(k_w, (nf_out, nf_in, 1, 1), dtype=jnp.float32) * \
        math.sqrt(1.0 / nf_in)
    bias = jax.random.uniform(k_b, (nf_out,), dtype=jnp.float32,
                              minval=-0.5, maxval=0.5)
    return weight, bias


def _reference_forward(x, weight, bias, act_fn):
    c_out = weight.shape[0]
    y = jnp.einsum("nchw,oc->nohw", x, weight.reshape(c_out, -1)) + \
        bias.reshape(1, c_out, 1, 1)
    if act_fn == "relu":
        y = jnp.maximum(y, 0.0)
        return (y - 0.4) / 0.58
    if act_fn == "comp":
        a = jnp.arctan(y)
        return jnp.concatenate([a / 0.67, a * a / 0.6], axis=1)
    if act_fn == "unbias":
        a = jnp.arctan(y)
        return jnp.concatenate([a / 0.67, (a * a - 0.45) / 0.396], axis=1)
    return jax.nn.sigmoid(y)


if __name__ == "__main__":
    key = jax.random.PRNGKey(0)
    k_x, k_p, k_x2, k_x3 = jax.random.split(key, 4)

    nf_in, nf_out = 4, 8
    n, h, w = 2, 16, 16

    x = jax.random.normal(k_x, (n, nf_in, h, w), dtype=jnp.float32)
    weight, bias = init_conv_layer_params(k_p, nf_in, nf_out)

    # 1) Every activation branch against a plain-JAX reference (f32 output).
    for act in ("relu", "comp", "unbias", "sigmoid"):
        out = jax.block_until_ready(conv_layer_forward(x, weight, bias, act_fn=act))
        ref = _reference_forward(x, weight, bias, act)
        c_final = 2 * nf_out if act in ("comp", "unbias") else nf_out
        assert out.shape == (n, c_final, h, w), (act, out.shape)
        max_err = float(jnp.max(jnp.abs(out - ref)))
        assert jnp.allclose(out, ref, atol=1e-4, rtol=1e-4), (act, max_err)

    # 2) Multi-image-per-step path (nb > 1: small H*W, larger batch).
    x2 = jax.random.normal(k_x2, (4, nf_in, h, w), dtype=jnp.float32)
    out2 = jax.block_until_ready(conv_layer_forward(x2, weight, bias, act_fn="comp"))
    ref2 = _reference_forward(x2, weight, bias, "comp")
    assert jnp.allclose(out2, ref2, atol=1e-4, rtol=1e-4), \
        float(jnp.max(jnp.abs(out2 - ref2)))

    # 3) Masked boundary pixel tile (hw not a multiple of the tile).
    x3 = jax.random.normal(k_x3, (1, nf_in, 10, 13), dtype=jnp.float32)
    out3 = jax.block_until_ready(
        conv_layer_forward(x3, weight, bias, act_fn="unbias", tile_p=128))
    ref3 = _reference_forward(x3, weight, bias, "unbias")
    assert jnp.allclose(out3, ref3, atol=1e-4, rtol=1e-4), \
        float(jnp.max(jnp.abs(out3 - ref3)))

    # 4) bfloat16 output path (halves store bytes on this write-heavy kernel).
    out_bf16 = jax.block_until_ready(
        conv_layer_forward(x, weight, bias, act_fn="comp",
                           out_dtype=jnp.bfloat16))
    ref_bf16 = _reference_forward(x, weight, bias, "comp")
    assert out_bf16.dtype == jnp.bfloat16
    assert jnp.allclose(out_bf16.astype(jnp.float32), ref_bf16, atol=5e-2), \
        float(jnp.max(jnp.abs(out_bf16.astype(jnp.float32) - ref_bf16)))

    print("KERNEL_OK")
</pallas_src>

<mosaic_0001>
module attributes {stable_mosaic.version = 11 : i64} {
  func.func @_conv1x1_act_kernel(%arg0: i32, %arg1: i32, %arg2: memref<1x4x256xf32, #tpu.memory_space<vmem>>, %arg3: memref<8x4xf32, #tpu.memory_space<vmem>>, %arg4: memref<8x1xf32, #tpu.memory_space<vmem>>, %arg5: memref<1x8x256xf32, #tpu.memory_space<vmem>>) attributes {dimension_semantics = [#tpu.dimension_semantics<parallel>, #tpu.dimension_semantics<parallel>], iteration_bounds = array<i64: 2, 1>, scalar_prefetch = 0 : i64, scratch_operands = 0 : i64, tpu.core_type = #tpu.core_type<tc>, window_params = [{transform_indices = @transform_0, window_bounds = array<i64: 1, 4, 256>}, {pipeline_mode = #tpu.pipeline_mode<synchronous>, transform_indices = @transform_1, window_bounds = array<i64: 8, 4>}, {pipeline_mode = #tpu.pipeline_mode<synchronous>, transform_indices = @transform_2, window_bounds = array<i64: 8, 1>}, {transform_indices = @transform_3, window_bounds = array<i64: 1, 8, 256>}]} {
    %c0 = arith.constant 0 : index
    %c0_0 = arith.constant 0 : index
    %0 = vector.load %arg3[%c0, %c0_0] : memref<8x4xf32, #tpu.memory_space<vmem>>, vector<8x4xf32>
    %c0_1 = arith.constant 0 : index
    %c0_2 = arith.constant 0 : index
    %1 = vector.load %arg4[%c0_1, %c0_2] : memref<8x1xf32, #tpu.memory_space<vmem>>, vector<8x1xf32>
    %c0_3 = arith.constant 0 : index
    %c0_4 = arith.constant 0 : index
    %c0_5 = arith.constant 0 : index
    %2 = vector.load %arg2[%c0_3, %c0_4, %c0_5] : memref<1x4x256xf32, #tpu.memory_space<vmem>>, vector<1x4x256xf32>
    %3 = vector.shape_cast %2 : vector<1x4x256xf32> to vector<4x256xf32>
    %4 = vector.extract_strided_slice %0 {offsets = [0, 0], sizes = [8, 1], strides = [1, 1]} : vector<8x4xf32> to vector<8x1xf32>
    %5 = vector.extract_strided_slice %3 {offsets = [0, 0], sizes = [1, 256], strides = [1, 1]} : vector<4x256xf32> to vector<1x256xf32>
    %6 = vector.broadcast %4 : vector<8x1xf32> to vector<8x256xf32>
    %7 = vector.broadcast %5 : vector<1x256xf32> to vector<8x256xf32>
    %8 = arith.mulf %6, %7 : vector<8x256xf32>
    %9 = vector.extract_strided_slice %0 {offsets = [0, 1], sizes = [8, 1], strides = [1, 1]} : vector<8x4xf32> to vector<8x1xf32>
    %10 = vector.extract_strided_slice %3 {offsets = [1, 0], sizes = [1, 256], strides = [1, 1]} : vector<4x256xf32> to vector<1x256xf32>
    %11 = vector.broadcast %9 : vector<8x1xf32> to vector<8x256xf32>
    %12 = vector.broadcast %10 : vector<1x256xf32> to vector<8x256xf32>
    %13 = arith.mulf %11, %12 : vector<8x256xf32>
    %14 = arith.addf %8, %13 : vector<8x256xf32>
    %15 = vector.extract_strided_slice %0 {offsets = [0, 2], sizes = [8, 1], strides = [1, 1]} : vector<8x4xf32> to vector<8x1xf32>
    %16 = vector.extract_strided_slice %3 {offsets = [2, 0], sizes = [1, 256], strides = [1, 1]} : vector<4x256xf32> to vector<1x256xf32>
    %17 = vector.broadcast %15 : vector<8x1xf32> to vector<8x256xf32>
    %18 = vector.broadcast %16 : vector<1x256xf32> to vector<8x256xf32>
    %19 = arith.mulf %17, %18 : vector<8x256xf32>
    %20 = arith.addf %14, %19 : vector<8x256xf32>
    %21 = vector.extract_strided_slice %0 {offsets = [0, 3], sizes = [8, 1], strides = [1, 1]} : vector<8x4xf32> to vector<8x1xf32>
    %22 = vector.extract_strided_slice %3 {offsets = [3, 0], sizes = [1, 256], strides = [1, 1]} : vector<4x256xf32> to vector<1x256xf32>
    %23 = vector.broadcast %21 : vector<8x1xf32> to vector<8x256xf32>
    %24 = vector.broadcast %22 : vector<1x256xf32> to vector<8x256xf32>
    %25 = arith.mulf %23, %24 : vector<8x256xf32>
    %26 = arith.addf %20, %25 : vector<8x256xf32>
    %27 = vector.broadcast %1 : vector<8x1xf32> to vector<8x256xf32>
    %28 = arith.addf %26, %27 : vector<8x256xf32>
    %cst = arith.constant 0.000000e+00 : f32
    %29 = vector.broadcast %cst : f32 to vector<8x256xf32>
    %30 = arith.maximumf %28, %29 : vector<8x256xf32>
    %cst_6 = arith.constant 0.689655185 : f32
    %31 = vector.broadcast %cst_6 : f32 to vector<8x256xf32>
    %32 = arith.subf %30, %31 : vector<8x256xf32>
    %c0_7 = arith.constant 0 : index
    %c0_8 = arith.constant 0 : index
    %c0_9 = arith.constant 0 : index
    %33 = vector.load %arg5[%c0_7, %c0_8, %c0_9] : memref<1x8x256xf32, #tpu.memory_space<vmem>>, vector<1x8x256xf32>
    %34 = vector.shape_cast %33 : vector<1x8x256xf32> to vector<8x256xf32>
    %35 = vector.shape_cast %32 : vector<8x256xf32> to vector<1x8x256xf32>
    tpu.vector_store %arg5[%c0_7, %c0_8, %c0_9], %35 {strides = array<i32>} : memref<1x8x256xf32, #tpu.memory_space<vmem>>, vector<1x8x256xf32>,
    return
  }
  func.func @transform_0(%arg0: i32, %arg1: i32) -> (i32, i32, i32) {
    %c0_i32 = arith.constant 0 : i32
    %c0_i32_0 = arith.constant 0 : i32
    return %arg0, %c0_i32, %arg1 : i32, i32, i32
  }
  func.func @transform_1(%arg0: i32, %arg1: i32) -> (i32, i32) {
    %c0_i32 = arith.constant 0 : i32
    %c0_i32_0 = arith.constant 0 : i32
    %c0_i32_1 = arith.constant 0 : i32
    return %c0_i32, %c0_i32_0 : i32, i32
  }
  func.func @transform_2(%arg0: i32, %arg1: i32) -> (i32, i32) {
    %c0_i32 = arith.constant 0 : i32
    %c0_i32_0 = arith.constant 0 : i32
    %c0_i32_1 = arith.constant 0 : i32
    return %c0_i32, %c0_i32_0 : i32, i32
  }
  func.func @transform_3(%arg0: i32, %arg1: i32) -> (i32, i32, i32) {
    %c0_i32 = arith.constant 0 : i32
    %c0_i32_0 = arith.constant 0 : i32
    return %arg0, %c0_i32, %arg1 : i32, i32, i32
  }
}

</mosaic_0001>

<bundles_post_ra>
// kernel: tpu_custom_call.1
= control target key start
LH: loop header
LB: loop body
LE: loop exit
PB: predicated region body
PF: predicated region fallthrough
CT: control target
= control target key end

     0   :  { %8 = vsyncpa [#allocation3], 0  ;;  %s656_s0 = inlined_call_operand.vmem [shape: f32[2,4,256], index: 0, kind: input, shape index: {}]   ;;  %s657_s1 = inlined_call_operand.vmem [shape: f32[8,4], index: 1, kind: input, shape index: {}]   ;;  %s658_s2 = inlined_call_operand.vmem [shape: f32[8,1], index: 2, kind: input, shape index: {}]   ;;  %s659_s3 = inlined_call_operand.hbm [shape: f32[2,8,256], index: 3, kind: output, shape index: {}]  }
   0x1   :  { %10 = vsyncpa [#allocation3 + $0x1], 0  ;;  %s553_s12 = smov 0   ;;  %s555_s13 = smov 0  }
   0x2   :  { %s557_s14 = smov 0   ;;  %s559_s15 = smov 0  }
   0x3   :  { %s561_s16 = smov 0   ;;  %s563_s17 = smov 0  }
   0x4 LB: > { %s367_s18 = sadd.s32 4294967295, %s527_s17   ;;  %s368_s19 = sadd.s32 4294967294, %s527_s17   ;;  %s527_s17 = sphi %s563_s17, %s16_s17   ;;  %s523_s16 = sphi %s561_s16, %s666_s16   ;;  %s519_s15 = sphi %s559_s15, %s665_s15   ;;  %s515_s14 = sphi %s557_s14, %s664_s14   ;;  %s511_s13 = sphi %s555_s13, %s663_s13   ;;  %s507_s12 = sphi %s553_s12, %s662_s12  }
   0x5   : > { %s28_s20 = sadd.s32 1, %s523_s16  ;;  %s107_s21 = sadd.s32 1, %s515_s14 }
   0x6   : > { %p30_p0 = scmp.ge.s32.totalorder %s28_s20, 2  ;;  %p117_p1 = scmp.ne.s32.totalorder %s515_s14, %s511_s13 }
   0x7   : > { %p118_p2 = scmp.eq.s32.totalorder %s367_s18, 1  ;;  %p123_p3 = scmp.ne.s32.totalorder %s511_s13, %s507_s12 }
   0x8   : > { %s668_s20 = smov (%p30_p0, %s28_s20), 0  ;;  %p124_p5 = scmp.eq.s32.totalorder %s368_s19, 1 }
   0x9   : > { %p593_p4 = por %p118_p2, %p117_p1  ;;  %s102_s23 = ssub.s32 %s523_s16, %s668_s20 }
   0xa   : > { %p371_p6 = scmp.ge.s32.totalorder %s527_s17, 1  ;;  %p105_p7 = scmp.eq.s32.totalorder %s102_s23, 0 }
   0xb   : > { %p600_p8 = por %p124_p5, %p123_p3  ;;  %p161_p9 = scmp.lt.s32.totalorder %s527_s17, 3 }
   0xc   : > { %s606_s25 = scalar_select %p105_p7, %s515_s14, %s107_s21  }
   0xd   : > { %p162_p10 = pnand %p371_p6, %p161_p9 }
   0xe   : > { %p190_p11 = scmp.lt.s32.totalorder (!%p162_p10), %s519_s15, 1  ;;  %s186_s8 = sand.u32 (!%p162_p10), 1, %s511_s13  }
   0xf   : > { %165 = sbr.rel (%p162_p10) target bundleno = 164 (0xa4), region = 32  ;;  %s372_s9 = sshll.u32 (!%p162_p10), %s186_s8, 4 }
  0x10   : > { %s383_s10 = sshll.u32 (!%p162_p10), %s519_s15, 4  ;;  %s188_s21 = scalar_lea.vmem (!%p162_p10), [#allocation2], %s372_s9 }
  0x11   : > { %s286_s19 = scalar_lea.hbm (!%p162_p10), %s659_s3, %s383_s10  ;;  %s288_s23 = sshll.u32 (!%p162_p10), %s188_s21, 4  ;;  %s289_s23 = int_to_ptr.vmem [resolvable:$true] %s288_s23 }
  0x12   : > { %s290_s26 = sshll.u32 (!%p162_p10), %s286_s19, 4  ;;  %s291_s26 = int_to_ptr.hbm [resolvable:$true] %s290_s26 }
  0x13   : > { %s463_s27 = sshra.s32 (!%p162_p10), %s291_s26, 4  ;;  %s464_s27 = int_to_ptr.hbm [resolvable:$true] %s463_s27 }
  0x14   : > { %v200_v0 = vld [vmem:[%s657_s1] sm:$0xff]  ;;  %v529_v1 = vmov 0   ;;  %v530_v2 = vmov 2   ;;  %v531_v4 = vmov 1   ;;  %v532_v5 = vmov 3   ;;  %s191_s30 = scalar_select %p190_p11, %s519_s15, 1 }
  0x15   : > { %443 = vset.pattern.permute.xlu0 %v529_v1  ;;  %445 = vset.pattern.permute.xlu1 %v530_v2  ;;  %v201_v3 = vld [vmem:[%s658_s2] sm:$0xff]  ;;  %s273_s15 = scalar_lea.sflag [#allocation3], %s186_s8  ;;  %s465_s28 = scalar_lea.hbm %s464_s27, 16 }
  0x16   : > { %205 = vperm.xlu0 %443, %v200_v0   ;;  %232 = vperm.xlu1 %445, %v200_v0   ;;  %s382_s4 = sshll.u32 %s191_s30, 3  ;;  %p466_p12 = scmp.ne.s32.totalorder %s464_s27, %s465_s28 }
  0x17   : > { %447 = vset.pattern.permute.xlu2 %v529_v1  ;;  %s197_s7 = scalar_lea.vmem %s656_s0, %s382_s4  ;;  %s469_s4 = scalar_lea.hbm %s659_s3, 32 }
  0x18   : > { %261 = vperm.xlu2 %447, %v201_v3   ;;  %v202_v6 = vld [vmem:[%s197_s7] sm:$0xff]  ;;  %p467_p13 = pnand %p466_p12, %p593_p4  ;;  %p470_p1 = scmp.lt.s32.totalorder %s464_s27, %s659_s3 }
  0x19   : > { %v209_v9 = vperm.slane %v202_v6, 0  ;;  %v210_v10 = vperm.slane %v202_v6, 4  ;;  %v221_v11 = vperm.slane %v202_v6, 1  ;;  %v222_v12 = vperm.slane %v202_v6, 5  ;;  %p471_p2 = scmp.lt.s32.totalorder %s469_s4, %s465_s28 }
  0x1a   : > { %v235_v13 = vperm.slane %v202_v6, 2  ;;  %v236_v14 = vperm.slane %v202_v6, 6  ;;  %v249_v15 = vperm.slane %v202_v6, 3  ;;  %v250_v16 = vperm.slane %v202_v6, 7  ;;  %p468_p0 = pneg %p467_p13 }
  0x1b   : > { %v213_v17 = vperm.slane %v209_v9, 0  ;;  %v214_v18 = vperm.slane %v210_v10, 0  ;;  %v225_v19 = vperm.slane %v221_v11, 1  ;;  %v226_v20 = vperm.slane %v222_v12, 1  ;;  %p472_p3 = por %p471_p2, %p470_p1 }
  0x1c   : > { %v239_v21 = vperm.slane %v235_v13, 2  ;;  %v240_v22 = vperm.slane %v236_v14, 2  ;;  %v253_v23 = vperm.slane %v249_v15, 3  ;;  %v254_v24 = vperm.slane %v250_v16, 3 }
  0x1d   : > { %p473_p5 = pnand %p472_p3, %p468_p0 }
  0x1e   : > { %444 = vset.pattern.permute.xlu0 %v531_v4  ;;  %446 = vset.pattern.permute.xlu1 %v532_v5 }
  0x1f   : > { %218 = vperm.xlu0 %444, %v200_v0   ;;  %246 = vperm.xlu1 %446, %v200_v0  }
  0x27   : > { %448 = vset.pattern.permute.xlu0 %v529_v1 }
  0x72   : > { %v262_v39 = vpop.permute.xlu2 %261 }
  0x88   : > { %v206_v7 = vpop.permute.xlu0 %205  ;;  %v233_v8 = vpop.permute.xlu1 %232 }
  0x89   : > { %v215_v27 = vmul.f32 %v213_v17, %v206_v7  ;;  %v216_v28 = vmul.f32 %v214_v18, %v206_v7  ;;  %v241_v31 = vmul.f32 %v239_v21, %v233_v8  ;;  %v242_v32 = vmul.f32 %v240_v22, %v233_v8 }
  0x91   : > { %v219_v25 = vpop.permute.xlu0 %218  ;;  %v247_v26 = vpop.permute.xlu1 %246 }
  0x92   : > { %v227_v29 = vmul.f32 %v225_v19, %v219_v25  ;;  %v228_v30 = vmul.f32 %v226_v20, %v219_v25  ;;  %v255_v35 = vmul.f32 %v253_v23, %v247_v26  ;;  %v256_v36 = vmul.f32 %v254_v24, %v247_v26 }
  0x94   : > { %v229_v33 = vadd.f32 %v227_v29, %v215_v27  ;;  %v230_v34 = vadd.f32 %v228_v30, %v216_v28 }
  0x96   : > { %v243_v37 = vadd.f32 %v241_v31, %v229_v33  ;;  %v244_v38 = vadd.f32 %v242_v32, %v230_v34 }
  0x98   : > { %v257_v40 = vadd.f32 %v255_v35, %v243_v37  ;;  %v258_v41 = vadd.f32 %v256_v36, %v244_v38 }
  0x9a   : > { %v264_v42 = vadd.f32 %v262_v39, %v257_v40  ;;  %v265_v43 = vadd.f32 %v262_v39, %v258_v41 }
  0x9c   : > { %v266_v44 = vmax.f32 %v264_v42, 0.0  ;;  %v267_v45 = vmax.f32 %v265_v43, 0.0 }
  0x9e   : > { %v375_v46 = vadd.f32 -0.6896552, %v266_v44  ;;  %v376_v47 = vadd.f32 -0.6896552, %v267_v45 }
  0xa0   : > { %270 = vst [vmem:[%s188_s21] sm:$0xff] %v375_v46 }
  0xa1   : > { %271 = vst [vmem:[%s188_s21 + $0x8] sm:$0xff] %v376_v47 }
  0xa2   : > { %476 = shalt.err (!%p473_p5)
}
  0xa3   : > { %384 = dma.vmem_to_hbm [thread:$0]  (%p593_p4), %s289_s23, 256, %s291_s26, %s273_s15  }
  0xa4 PF: > { %p390_p6 = scmp.ge.s32.totalorder %s527_s17, 2  ;;  %s302_s7 = sand.u32 1, %s507_s12  }
  0xa5   : > { %s303_s8 = scalar_lea.sflag [#allocation3], %s302_s7 }
  0xa6   : > { %p387_p7 = pnand %p390_p6, %p600_p8 }
  0xa8   : > { %p388_p9 = pneg %p387_p7 }
  0xaa   : > { %502 = dma.done.wait (%p388_p9), %s303_s8, 256  }
  0xab   : > { %504 = vsyncadd (%p388_p9), %s303_s8, 4294967040  ;;  %s16_s17 = sadd.s32 1, %s527_s17   ;;  %s662_s12 = smov %s511_s13 }
  0xac   : > { %p13_p10 = scmp.ge.s32.totalorder %s16_s17, 4   ;;  %s663_s13 = smov %s515_s14 }
  0xad   : > { %s664_s14 = smov %s606_s25  ;;  %s665_s15 = smov %s523_s16 }
  0xae   : > { %s666_s16 = smov %s668_s20  ;;  %15 = sbr.rel (!%p13_p10) target bundleno = 4 (0x4), region = 67 }
  0xb3   :  { %309 = vsyncpa [#allocation3], 1 }
  0xb4   :  { %311 = vsyncpa [#allocation3 + $0x1], 1 }

</bundles_post_ra>
